<compile_context>
chip_gen: v6e
topology: v6e:2x2x1
jax: 0.10.0
libtpu: 0.0.40
codegen_flags: <defaults>
</compile_context>

<pallas_src>
import functools

import jax
import jax.numpy as jnp
from jax.experimental import pallas as pl
from jax.experimental.pallas import tpu as pltpu

# Logical (PyTorch) layer dims.
IN_DIM, H1, H2, H3, OUT_DIM = 27, 300, 100, 20, 4
# Padded, lane/sublane-friendly hidden dims used inside the kernel
# (zero padding is exact through ReLU).  Input K=27 and output N=4 are left
# unpadded.
D1, D2, D3 = 384, 128, 32


def mlp_kernel(x_ref,
               w1_ref, b1_ref,
               w2_ref, b2_ref,
               w3_ref, b3_ref,
               w4_ref, b4_ref,
               o_ref):
    # Layer 1: f32 (tile_b, 27) @ f32 (27, 384) on the MXU (Mosaic masks the
    # non-aligned K=27); bias + ReLU in f32 on the VPU.
    h = jnp.dot(x_ref[...], w1_ref[...], preferred_element_type=jnp.float32)
    h = jnp.maximum(h + b1_ref[...], 0.0)

    # Layer 2 (FLOP majority): bf16 operands, f32 MXU accumulation.
    h = jnp.dot(h.astype(jnp.bfloat16), w2_ref[...],
                preferred_element_type=jnp.float32)
    h = jnp.maximum(h + b2_ref[...], 0.0)

    # Layers 3/4: tiny, stay f32.
    h = jnp.dot(h, w3_ref[...], preferred_element_type=jnp.float32)
    h = jnp.maximum(h + b3_ref[...], 0.0)

    h = jnp.dot(h, w4_ref[...], preferred_element_type=jnp.float32)
    o_ref[...] = (h + b4_ref[...]).astype(o_ref.dtype)


def _round_up(x, m):
    return ((x + m - 1) // m) * m


def prepare_params(params):
    """One-time padding/casting of (W, b) pairs (call OUTSIDE the forward).

    Hidden dims are zero-padded to (384, 128, 32); padded units have zero
    weight and zero bias, stay zero through ReLU, and contribute nothing
    downstream, so results are exact.  W2 (the FLOP majority) is bf16.
    """
    (w1, b1), (w2, b2), (w3, b3), (w4, b4) = params
    w1p = jnp.zeros((IN_DIM, D1), jnp.float32).at[:, :H1].set(w1)
    b1p = jnp.zeros((1, D1), jnp.float32).at[:, :H1].set(b1)
    w2p = jnp.zeros((D1, D2), jnp.float32).at[:H1, :H2].set(w2).astype(jnp.bfloat16)
    b2p = jnp.zeros((1, D2), jnp.float32).at[:, :H2].set(b2)
    w3p = jnp.zeros((D2, D3), jnp.float32).at[:H2, :H3].set(w3)
    b3p = jnp.zeros((1, D3), jnp.float32).at[:, :H3].set(b3)
    w4p = jnp.zeros((D3, OUT_DIM), jnp.float32).at[:H3, :].set(w4)
    b4p = b4.astype(jnp.float32)  # (1, 4)
    return (w1p, b1p, w2p, b2p, w3p, b3p, w4p, b4p)


@functools.partial(jax.jit, static_argnames=("block_b",))
def mlp_forward(x, padded_params, *, block_b=512):
    """x: (batch, 27) float32. padded_params: output of prepare_params."""
    batch = x.shape[0]
    w1, b1, w2, b2, w3, b3, w4, b4 = padded_params

    # Batch tile: whole batch for small inputs (full-dim block is always
    # legal); otherwise at least 2 grid steps so v7x's two TensorCores both
    # get work, capped at block_b rows for single-core v5e/v6e.
    if batch >= 64:
        tile_b = min(block_b, _round_up(-(-batch // 2), 16))
    else:
        tile_b = batch
    grid = (pl.cdiv(batch, tile_b),)

    def resident(a):
        # Full-array block with a constant index_map -> stays VMEM-resident
        # across all batch-grid steps.
        return pl.BlockSpec(a.shape, lambda i: (0, 0))

    flops = 2 * batch * (IN_DIM * H1 + H1 * H2 + H2 * H3 + H3 * OUT_DIM)
    bytes_accessed = batch * (IN_DIM + OUT_DIM) * 4 + sum(
        int(a.size) * a.dtype.itemsize for a in padded_params)

    out = pl.pallas_call(
        mlp_kernel,
        out_shape=jax.ShapeDtypeStruct((batch, OUT_DIM), jnp.float32),
        grid=grid,
        in_specs=[
            pl.BlockSpec((tile_b, IN_DIM), lambda i: (i, 0)),
            resident(w1), resident(b1),
            resident(w2), resident(b2),
            resident(w3), resident(b3),
            resident(w4), resident(b4),
        ],
        out_specs=pl.BlockSpec((tile_b, OUT_DIM), lambda i: (i, 0)),
        compiler_params=pltpu.CompilerParams(
            dimension_semantics=("parallel",)),
        cost_estimate=pl.CostEstimate(
            flops=flops, transcendentals=0, bytes_accessed=bytes_accessed),
    )(x, w1, b1, w2, b2, w3, b3, w4, b4)
    return out


def init_params(key):
    """Deterministic init mimicking nn.Linear default (uniform +/- 1/sqrt(fan_in))."""
    dims = [(IN_DIM, H1), (H1, H2), (H2, H3), (H3, OUT_DIM)]
    params = []
    for fan_in, fan_out in dims:
        key, kw, kb = jax.random.split(key, 3)
        bound = 1.0 / (fan_in ** 0.5)
        w = jax.random.uniform(kw, (fan_in, fan_out), jnp.float32, -bound, bound)
        b = jax.random.uniform(kb, (1, fan_out), jnp.float32, -bound, bound)
        params.append((w, b))
    return params


def reference_forward(x, params):
    h = x
    for i, (w, b) in enumerate(params):
        h = h @ w + b
        if i < len(params) - 1:
            h = jnp.maximum(h, 0.0)
    return h


if __name__ == "__main__":
    key = jax.random.PRNGKey(0)
    key, kx = jax.random.split(key)
    batch = 8
    x = jax.random.normal(kx, (batch, IN_DIM), jnp.float32)

    params = init_params(key)
    padded_params = prepare_params(params)   # hoisted: pad/cast weights once

    out = mlp_forward(x, padded_params)
    out = jax.block_until_ready(out)

    ref = reference_forward(x, params)
    assert out.shape == (batch, OUT_DIM)
    # Layer 2 runs with bf16 operands (f32 accumulation) -> loosened tolerance.
    assert jnp.allclose(out, ref, atol=5e-2, rtol=5e-2), \
        float(jnp.max(jnp.abs(out - ref)))

    print("KERNEL_OK")
</pallas_src>

<mosaic_0001>
module attributes {stable_mosaic.version = 11 : i64} {
  func.func @mlp_kernel(%arg0: i32, %arg1: memref<8x27xf32, #tpu.memory_space<vmem>>, %arg2: memref<27x384xf32, #tpu.memory_space<vmem>>, %arg3: memref<1x384xf32, #tpu.memory_space<vmem>>, %arg4: memref<384x128xbf16, #tpu.memory_space<vmem>>, %arg5: memref<1x128xf32, #tpu.memory_space<vmem>>, %arg6: memref<128x32xf32, #tpu.memory_space<vmem>>, %arg7: memref<1x32xf32, #tpu.memory_space<vmem>>, %arg8: memref<32x4xf32, #tpu.memory_space<vmem>>, %arg9: memref<1x4xf32, #tpu.memory_space<vmem>>, %arg10: memref<8x4xf32, #tpu.memory_space<vmem>>) attributes {dimension_semantics = [#tpu.dimension_semantics<parallel>], iteration_bounds = array<i64: 1>, scalar_prefetch = 0 : i64, scratch_operands = 0 : i64, tpu.core_type = #tpu.core_type<tc>, window_params = [{transform_indices = @transform_0, window_bounds = array<i64: 8, 27>}, {pipeline_mode = #tpu.pipeline_mode<synchronous>, transform_indices = @transform_1, window_bounds = array<i64: 27, 384>}, {pipeline_mode = #tpu.pipeline_mode<synchronous>, transform_indices = @transform_2, window_bounds = array<i64: 1, 384>}, {pipeline_mode = #tpu.pipeline_mode<synchronous>, transform_indices = @transform_3, window_bounds = array<i64: 384, 128>}, {pipeline_mode = #tpu.pipeline_mode<synchronous>, transform_indices = @transform_4, window_bounds = array<i64: 1, 128>}, {pipeline_mode = #tpu.pipeline_mode<synchronous>, transform_indices = @transform_5, window_bounds = array<i64: 128, 32>}, {pipeline_mode = #tpu.pipeline_mode<synchronous>, transform_indices = @transform_6, window_bounds = array<i64: 1, 32>}, {pipeline_mode = #tpu.pipeline_mode<synchronous>, transform_indices = @transform_7, window_bounds = array<i64: 32, 4>}, {pipeline_mode = #tpu.pipeline_mode<synchronous>, transform_indices = @transform_8, window_bounds = array<i64: 1, 4>}, {transform_indices = @transform_9, window_bounds = array<i64: 8, 4>}]} {
    %c0 = arith.constant 0 : index
    %c0_0 = arith.constant 0 : index
    %0 = vector.load %arg1[%c0, %c0_0] : memref<8x27xf32, #tpu.memory_space<vmem>>, vector<8x27xf32>
    %c0_1 = arith.constant 0 : index
    %c0_2 = arith.constant 0 : index
    %1 = vector.load %arg2[%c0_1, %c0_2] : memref<27x384xf32, #tpu.memory_space<vmem>>, vector<27x384xf32>
    %cst = arith.constant dense<0.000000e+00> : vector<8x384xf32>
    %2 = tpu.matmul %0, %1, %cst {dimension_numbers = #tpu.dot_dimension_numbers<[1], [0], [0], [1], [0, 0, 1, 1], [], []>} : vector<8x27xf32>, vector<27x384xf32>, vector<8x384xf32> -> vector<8x384xf32>
    %c0_3 = arith.constant 0 : index
    %c0_4 = arith.constant 0 : index
    %3 = vector.load %arg3[%c0_3, %c0_4] : memref<1x384xf32, #tpu.memory_space<vmem>>, vector<1x384xf32>
    %4 = vector.broadcast %3 : vector<1x384xf32> to vector<8x384xf32>
    %5 = arith.addf %2, %4 : vector<8x384xf32>
    %cst_5 = arith.constant 0.000000e+00 : f32
    %6 = vector.broadcast %cst_5 : f32 to vector<8x384xf32>
    %7 = arith.maximumf %5, %6 : vector<8x384xf32>
    %8 = arith.truncf %7 : vector<8x384xf32> to vector<8x384xbf16>
    %c0_6 = arith.constant 0 : index
    %c0_7 = arith.constant 0 : index
    %9 = vector.load %arg4[%c0_6, %c0_7] : memref<384x128xbf16, #tpu.memory_space<vmem>>, vector<384x128xbf16>
    %cst_8 = arith.constant dense<0.000000e+00> : vector<8x128xf32>
    %10 = tpu.matmul %8, %9, %cst_8 {dimension_numbers = #tpu.dot_dimension_numbers<[1], [0], [0], [1], [0, 0, 1, 1], [], []>} : vector<8x384xbf16>, vector<384x128xbf16>, vector<8x128xf32> -> vector<8x128xf32>
    %c0_9 = arith.constant 0 : index
    %c0_10 = arith.constant 0 : index
    %11 = vector.load %arg5[%c0_9, %c0_10] : memref<1x128xf32, #tpu.memory_space<vmem>>, vector<1x128xf32>
    %12 = vector.broadcast %11 : vector<1x128xf32> to vector<8x128xf32>
    %13 = arith.addf %10, %12 : vector<8x128xf32>
    %cst_11 = arith.constant 0.000000e+00 : f32
    %14 = vector.broadcast %cst_11 : f32 to vector<8x128xf32>
    %15 = arith.maximumf %13, %14 : vector<8x128xf32>
    %c0_12 = arith.constant 0 : index
    %c0_13 = arith.constant 0 : index
    %16 = vector.load %arg6[%c0_12, %c0_13] : memref<128x32xf32, #tpu.memory_space<vmem>>, vector<128x32xf32>
    %cst_14 = arith.constant dense<0.000000e+00> : vector<8x32xf32>
    %17 = tpu.matmul %15, %16, %cst_14 {dimension_numbers = #tpu.dot_dimension_numbers<[1], [0], [0], [1], [0, 0, 1, 1], [], []>} : vector<8x128xf32>, vector<128x32xf32>, vector<8x32xf32> -> vector<8x32xf32>
    %c0_15 = arith.constant 0 : index
    %c0_16 = arith.constant 0 : index
    %18 = vector.load %arg7[%c0_15, %c0_16] : memref<1x32xf32, #tpu.memory_space<vmem>>, vector<1x32xf32>
    %19 = vector.broadcast %18 : vector<1x32xf32> to vector<8x32xf32>
    %20 = arith.addf %17, %19 : vector<8x32xf32>
    %cst_17 = arith.constant 0.000000e+00 : f32
    %21 = vector.broadcast %cst_17 : f32 to vector<8x32xf32>
    %22 = arith.maximumf %20, %21 : vector<8x32xf32>
    %c0_18 = arith.constant 0 : index
    %c0_19 = arith.constant 0 : index
    %23 = vector.load %arg8[%c0_18, %c0_19] : memref<32x4xf32, #tpu.memory_space<vmem>>, vector<32x4xf32>
    %cst_20 = arith.constant dense<0.000000e+00> : vector<8x4xf32>
    %24 = tpu.matmul %22, %23, %cst_20 {dimension_numbers = #tpu.dot_dimension_numbers<[1], [0], [0], [1], [0, 0, 1, 1], [], []>} : vector<8x32xf32>, vector<32x4xf32>, vector<8x4xf32> -> vector<8x4xf32>
    %c0_21 = arith.constant 0 : index
    %c0_22 = arith.constant 0 : index
    %25 = vector.load %arg9[%c0_21, %c0_22] : memref<1x4xf32, #tpu.memory_space<vmem>>, vector<1x4xf32>
    %26 = vector.broadcast %25 : vector<1x4xf32> to vector<8x4xf32>
    %27 = arith.addf %24, %26 : vector<8x4xf32>
    %c0_23 = arith.constant 0 : index
    %c0_24 = arith.constant 0 : index
    %28 = vector.load %arg10[%c0_23, %c0_24] : memref<8x4xf32, #tpu.memory_space<vmem>>, vector<8x4xf32>
    tpu.vector_store %arg10[%c0_23, %c0_24], %27 {strides = array<i32>} : memref<8x4xf32, #tpu.memory_space<vmem>>, vector<8x4xf32>,
    return
  }
  func.func @transform_0(%arg0: i32) -> (i32, i32) {
    %c0_i32 = arith.constant 0 : i32
    %c0_i32_0 = arith.constant 0 : i32
    return %arg0, %c0_i32 : i32, i32
  }
  func.func @transform_1(%arg0: i32) -> (i32, i32) {
    %c0_i32 = arith.constant 0 : i32
    %c0_i32_0 = arith.constant 0 : i32
    %c0_i32_1 = arith.constant 0 : i32
    return %c0_i32, %c0_i32_0 : i32, i32
  }
  func.func @transform_2(%arg0: i32) -> (i32, i32) {
    %c0_i32 = arith.constant 0 : i32
    %c0_i32_0 = arith.constant 0 : i32
    %c0_i32_1 = arith.constant 0 : i32
    return %c0_i32, %c0_i32_0 : i32, i32
  }
  func.func @transform_3(%arg0: i32) -> (i32, i32) {
    %c0_i32 = arith.constant 0 : i32
    %c0_i32_0 = arith.constant 0 : i32
    %c0_i32_1 = arith.constant 0 : i32
    return %c0_i32, %c0_i32_0 : i32, i32
  }
  func.func @transform_4(%arg0: i32) -> (i32, i32) {
    %c0_i32 = arith.constant 0 : i32
    %c0_i32_0 = arith.constant 0 : i32
    %c0_i32_1 = arith.constant 0 : i32
    return %c0_i32, %c0_i32_0 : i32, i32
  }
  func.func @transform_5(%arg0: i32) -> (i32, i32) {
    %c0_i32 = arith.constant 0 : i32
    %c0_i32_0 = arith.constant 0 : i32
    %c0_i32_1 = arith.constant 0 : i32
    return %c0_i32, %c0_i32_0 : i32, i32
  }
  func.func @transform_6(%arg0: i32) -> (i32, i32) {
    %c0_i32 = arith.constant 0 : i32
    %c0_i32_0 = arith.constant 0 : i32
    %c0_i32_1 = arith.constant 0 : i32
    return %c0_i32, %c0_i32_0 : i32, i32
  }
  func.func @transform_7(%arg0: i32) -> (i32, i32) {
    %c0_i32 = arith.constant 0 : i32
    %c0_i32_0 = arith.constant 0 : i32
    %c0_i32_1 = arith.constant 0 : i32
    return %c0_i32, %c0_i32_0 : i32, i32
  }
  func.func @transform_8(%arg0: i32) -> (i32, i32) {
    %c0_i32 = arith.constant 0 : i32
    %c0_i32_0 = arith.constant 0 : i32
    %c0_i32_1 = arith.constant 0 : i32
    return %c0_i32, %c0_i32_0 : i32, i32
  }
  func.func @transform_9(%arg0: i32) -> (i32, i32) {
    %c0_i32 = arith.constant 0 : i32
    %c0_i32_0 = arith.constant 0 : i32
    return %arg0, %c0_i32 : i32, i32
  }
}

</mosaic_0001>

<bundles_post_ra>
// kernel: mlp_forward.1
= control target key start
LH: loop header
LB: loop body
LE: loop exit
PB: predicated region body
PF: predicated region fallthrough
CT: control target
= control target key end

     0   :  { %14 = vsyncpa [#allocation3], 0  ;;  %s1214_s0 = inlined_call_operand.vmem [shape: f32[8,27], index: 0, kind: input, shape index: {}]   ;;  %s1215_s1 = inlined_call_operand.hbm [shape: f32[27,384], index: 1, kind: input, shape index: {}]   ;;  %s1216_s2 = inlined_call_operand.hbm [shape: f32[1,384], index: 2, kind: input, shape index: {}]   ;;  %s1217_s3 = inlined_call_operand.vmem [shape: bf16[384,128], index: 3, kind: input, shape index: {}]   ;;  %s1218_s4 = inlined_call_operand.vmem [shape: f32[1,128], index: 4, kind: input, shape index: {}]   ;;  %s1219_s5 = inlined_call_operand.vmem [shape: f32[128,32], index: 5, kind: input, shape index: {}]   ;;  %s1220_s6 = inlined_call_operand.vmem [shape: f32[1,32], index: 6, kind: input, shape index: {}]   ;;  %s1221_s7 = inlined_call_operand.vmem [shape: f32[32,4], index: 7, kind: input, shape index: {}]   ;;  %s1222_s8 = inlined_call_operand.vmem [shape: f32[1,4], index: 8, kind: input, shape index: {}]   ;;  %s1223_s9 = inlined_call_operand.vmem [shape: f32[8,4], index: 9, kind: output, shape index: {}]  }
   0x1   :  { %15 = vsyncpa [#allocation5], 0  ;;  %s959_s30 = smov [#allocation2]  }
   0x2   :  { %s23_s10 = sshll.u32 %s959_s30, 4  ;;  %s24_s10 = int_to_ptr.vmem [resolvable:$true] %s23_s10 }
   0x3   :  { %s923_s11 = scalar_lea.vmem %s24_s10, 1536  ;;  %p928_p1 = scmp.lt.s32.totalorder %s24_s10, %s24_s10 }
   0x4   :  { %p924_p0 = scmp.ne.s32.totalorder %s24_s10, %s923_s11  ;;  %p929_p2 = scmp.lt.s32.totalorder %s923_s11, %s923_s11 }
   0x6   :  { %p930_p3 = por %p929_p2, %p928_p1 }
   0x8   :  { %p931_p4 = pnand %p930_p3, %p924_p0 }
   0xa   :  { %934 = shalt.err (!%p931_p4)
}
   0xb   :  { %s960_s12 = smov 384   ;;  %s961_s13 = smov 24  }
   0xc   :  { %29 = dma.hbm_to_vmem [thread:$0]  %s1215_s1, 1536, %s24_s10, [#allocation3], %s960_s12, %s960_s12, %s961_s13  }
   0xd   :  { %s962_s16 = smov [#allocation4]  }
   0xe   :  { %s36_s17 = sshll.u32 %s962_s16, 4  ;;  %s37_s17 = int_to_ptr.vmem [resolvable:$true] %s36_s17 }
   0xf   :  { %s943_s18 = scalar_lea.vmem %s37_s17, 48  ;;  %s947_s19 = scalar_lea.vmem %s37_s17, 64 }
  0x10   :  { %p944_p5 = scmp.ne.s32.totalorder %s37_s17, %s943_s18  ;;  %p948_p6 = scmp.lt.s32.totalorder %s37_s17, %s37_s17 }
  0x11   :  { %p949_p7 = scmp.lt.s32.totalorder %s947_s19, %s943_s18 }
  0x13   :  { %p950_p8 = por %p949_p7, %p948_p6 }
  0x15   :  { %p951_p9 = pnand %p950_p8, %p944_p5 }
  0x17   :  { %954 = shalt.err (!%p951_p9)
}
  0x18   :  { %39 = dma.hbm_to_vmem [thread:$0]  %s1216_s2, 48, %s37_s17, [#allocation5]  }
  0x19   :  { %955 = dma.done.wait [#allocation3], 1536  }
  0x1a   :  { %956 = vsyncadd [#allocation3], 4294965760 }
  0x1b   :  { %957 = dma.done.wait [#allocation5], 48  }
  0x1c   :  { %958 = vsyncadd [#allocation5], 4294967248  ;;  %v963_v0 = vmov 0.0   ;;  %vm93_vm0 = vcmask 1042432   ;;  %v70_v1 = vld [vmem:[#allocation2 + $0x50] sm:$0x7]  ;;  %v74_v38 = vlaneseq }
  0x1d   :  { %167 = vmatprep.mubr.f32.mxu1 %v963_v0  ;;  %v69_v2 = vld [vmem:[#allocation2 + $0x48] sm:$0x7]  ;;  %v67_v3 = vld [vmem:[#allocation2 + $0x38] sm:$0xff]  ;;  %717 = vmatprep.subr.msk.mxu1 %vm93_vm0, %v70_v1  ;;  %v66_v4 = vld [vmem:[#allocation2 + $0x30] sm:$0xff]  ;;  %vm89_vm1 = vcmask 220160   ;;  %vm964_vm2 = vmmov 0  }
  0x1e   :  { %718 = vmatpush1.msk.msra.mxu1 %vm93_vm0, %v69_v2  ;;  %v64_v5 = vld [vmem:[#allocation2 + $0x20] sm:$0xff]  ;;  %v63_v6 = vld [vmem:[#allocation2 + $0x18] sm:$0xff]  ;;  %v61_v7 = vld [vmem:[#allocation2 + $0x8] sm:$0xff]  ;;  %v75_v39 = vshrl.u32 %v74_v38, 7  ;;  %vm635_vm3 = vcmask 261120   ;;  %vm709_vm4 = vcmask 31744  }
  0x1f   :  { %129 = vmatprep.subr.mxu1 %v67_v3  ;;  %v60_v8 = vld [vmem:[#allocation2] sm:$0xff]  ;;  %v71_v10 = vld [vmem:[#allocation2 + $0x58] sm:$0x7]  ;;  %v893_v14 = vld [vmem:[%s1217_s3 + $0x70] sm:$0xff]  }
  0x20   :  { %130 = vmatpush1.msra.mxu1 %v66_v4  ;;  %v59_v9 = vld [vmem:[%s1214_s0] sm:$0xff]  ;;  %v891_v11 = vld [vmem:[%s1217_s3 + $0x78] sm:$0xff]   ;;  %v894_v15 = vld [vmem:[%s1217_s3 + $0x30] sm:$0xff]   ;;  %v76_v40 = vsub.s32 0, %v75_v39  ;;  %v80_v42 = vsub.s32 1, %v75_v39  ;;  %v84_v47 = vsub.s32 2, %v75_v39 }
  0x21   :  { %131 = vmatprep.subr.mxu1 %v64_v5  ;;  %v892_v12 = vld [vmem:[%s1217_s3 + $0x38] sm:$0xff]   ;;  %v68_v13 = vld [vmem:[#allocation2 + $0x40] sm:$0xff]  ;;  %755 = vmatprep.subr.bf16.mxu0 %v891_v11  ;;  %v65_v16 = vld [vmem:[#allocation2 + $0x28] sm:$0xff] }
  0x22   :  { %132 = vmatpush1.msra.mxu1 %v63_v6  ;;  %756 = vmatpush3.bf16.msra.mxu0 %v892_v12  ;;  %v896_v17 = vld [vmem:[%s1217_s3 + $0x68] sm:$0xff]   ;;  %v62_v18 = vld [vmem:[#allocation2 + $0x10] sm:$0xff]  ;;  %v895_v20 = vld [vmem:[%s1217_s3 + $0xb8] sm:$0xff]  }
  0x23   :  { %133 = vmatprep.subr.mxu1 %v61_v7  ;;  %757 = vmatprep.subr.bf16.mxu0 %v893_v14  ;;  %v897_v19 = vld [vmem:[%s1217_s3 + $0x28] sm:$0xff]   ;;  %v899_v21 = vld [vmem:[%s1217_s3 + $0x60] sm:$0xff]   ;;  %v902_v23 = vld [vmem:[%s1217_s3 + $0x58] sm:$0xff]  }
  0x24   :  { %134 = vmatpush1.msra.mxu1 %v60_v8  ;;  %v900_v22 = vld [vmem:[%s1217_s3 + $0x20] sm:$0xff]   ;;  %v898_v24 = vld [vmem:[%s1217_s3 + $0xb0] sm:$0xff]   ;;  %v901_v25 = vld [vmem:[%s1217_s3 + $0xa8] sm:$0xff]  }
  0x25   :  { %719 = vmatmul.mubr.msk.f32.vlgmr.msra.gmra.mxu1 %vm89_vm1, %v59_v9  ;;  %808 = vmatprep.subr.mxu1 %v963_v0  ;;  %v903_v26 = vld [vmem:[%s1217_s3 + $0x18] sm:$0xff]   ;;  %v905_v27 = vld [vmem:[%s1217_s3 + $0x50] sm:$0xff]   ;;  %v904_v29 = vld [vmem:[%s1217_s3 + $0xa0] sm:$0xff]  }
  0x26   :  { %809 = vmatpush3.msk.msra.mxu1 %vm93_vm0, %v71_v10  ;;  %816 = vmatprep.mubr.msk.f32.mxu1 %vm964_vm2, %v963_v0  ;;  %v906_v28 = vld [vmem:[%s1217_s3 + $0x10] sm:$0xff]   ;;  %v907_v30 = vld [vmem:[%s1217_s3 + $0x98] sm:$0xff]   ;;  %v908_v31 = vld [vmem:[%s1217_s3 + $0x48] sm:$0xff]  }
  0x27   :  { %810 = vmatprep.subr.mxu1 %v963_v0  ;;  %758 = vmatpush3.bf16.msra.mxu0 %v894_v15  ;;  %v909_v32 = vld [vmem:[%s1217_s3 + $0x8] sm:$0xff]   ;;  %v910_v33 = vld [vmem:[%s1217_s3 + $0x90] sm:$0xff]   ;;  %v911_v34 = vld [vmem:[%s1217_s3 + $0x40] sm:$0xff]  }
  0x28   :  { %811 = vmatpush3.msra.mxu1 %v68_v13  ;;  %759 = vmatprep.subr.bf16.mxu0 %v896_v17  ;;  %v912_v35 = vld [vmem:[%s1217_s3] sm:$0xff]   ;;  %v913_v36 = vld [vmem:[%s1217_s3 + $0x88] sm:$0xff]   ;;  %v545_v56 = vld [vmem:[%s1219_s5 + $0x78] sm:$0xff] }
  0x29   :  { %812 = vmatprep.subr.mxu1 %v963_v0  ;;  %v914_v37 = vld [vmem:[%s1217_s3 + $0x80] sm:$0xff]   ;;  %v544_v59 = vld [vmem:[%s1219_s5 + $0x70] sm:$0xff]  ;;  %v543_v61 = vld [vmem:[%s1219_s5 + $0x68] sm:$0xff] }
  0x2a   :  { %813 = vmatpush3.msra.mxu1 %v65_v16  ;;  %v72_v41 = vld [vmem:[#allocation4] sm:$0x7]  ;;  %v541_v1 = vld [vmem:[%s1219_s5 + $0x58] sm:$0xff]  ;;  %v540_v2 = vld [vmem:[%s1219_s5 + $0x50] sm:$0xff] }
  0x2b   :  { %814 = vmatprep.subr.mxu1 %v963_v0  ;;  %760 = vmatpush3.bf16.msra.mxu0 %v897_v19  ;;  %v77_v43 = vrot.slane %v72_v41, %v76_v40  ;;  %v81_v44 = vrot.slane %v72_v41, %v80_v42  ;;  %v85_v51 = vrot.slane %v72_v41, %v84_v47  ;;  %v542_v63 = vld [vmem:[%s1219_s5 + $0x60] sm:$0xff]  ;;  %v539_v3 = vld [vmem:[%s1219_s5 + $0x48] sm:$0xff]  ;;  %v537_v5 = vld [vmem:[%s1219_s5 + $0x38] sm:$0xff] }
  0x2c   :  { %815 = vmatpush3.msra.mxu1 %v62_v18  ;;  %761 = vmatprep.subr.bf16.mxu0 %v899_v21  ;;  %v538_v4 = vld [vmem:[%s1219_s5 + $0x40] sm:$0xff]  ;;  %v536_v6 = vld [vmem:[%s1219_s5 + $0x30] sm:$0xff]  ;;  %v535_v7 = vld [vmem:[%s1219_s5 + $0x28] sm:$0xff] }
  0x2d   :  { %817 = vmatmul.mubr.msk.f32.vlgmr.msra.gmra.mxu1 %vm89_vm1, %v59_v9  ;;  %819 = vmatprep.subr.bf16.mxu1 %v963_v0  ;;  %v534_v8 = vld [vmem:[%s1219_s5 + $0x20] sm:$0xff]  ;;  %v533_v9 = vld [vmem:[%s1219_s5 + $0x18] sm:$0xff]  ;;  %v532_v10 = vld [vmem:[%s1219_s5 + $0x10] sm:$0xff] }
  0x2e   :  { %820 = vmatpush3.bf16.msra.mxu1 %v895_v20  ;;  %835 = vmatprep.mubr.msk.bf16.mxu1 %vm964_vm2, %v963_v0  ;;  %v531_v11 = vld [vmem:[%s1219_s5 + $0x8] sm:$0xff]  ;;  %v530_v12 = vld [vmem:[%s1219_s5] sm:$0xff]  ;;  %v627_v13 = vld [vmem:[%s1221_s7 + $0x18] sm:$0xff] }
  0x2f   :  { %821 = vmatprep.subr.bf16.mxu1 %v963_v0  ;;  %762 = vmatpush3.bf16.msra.mxu0 %v900_v22  ;;  %v626_v14 = vld [vmem:[%s1221_s7 + $0x10] sm:$0xff]  ;;  %v722_v17 = vld [vmem:[%s1218_s4] ss:$0 sm:$0xff] }
  0x30   :  { %763 = vmatprep.subr.bf16.mxu0 %v902_v23 }
  0x32   :  { %822 = vmatpush3.bf16.msra.mxu1 %v898_v24 }
  0x33   :  { %823 = vmatprep.subr.bf16.mxu1 %v963_v0  ;;  %764 = vmatpush3.bf16.msra.mxu0 %v903_v26 }
  0x34   :  { %765 = vmatprep.subr.bf16.mxu0 %v905_v27 }
  0x36   :  { %824 = vmatpush3.bf16.msra.mxu1 %v901_v25 }
  0x37   :  { %825 = vmatprep.subr.bf16.mxu1 %v963_v0  ;;  %766 = vmatpush3.bf16.msra.mxu0 %v906_v28  ;;  %v625_v28 = vld [vmem:[%s1221_s7 + $0x8] sm:$0xff] }
  0x38   :  { %767 = vmatprep.subr.bf16.mxu0 %v908_v31 }
  0x3a   :  { %826 = vmatpush3.bf16.msra.mxu1 %v904_v29  ;;  %v624_v29 = vld [vmem:[%s1221_s7] sm:$0xff] }
  0x3b   :  { %827 = vmatprep.subr.bf16.mxu1 %v963_v0  ;;  %768 = vmatpush3.bf16.msra.mxu0 %v909_v32 }
  0x3c   :  { %769 = vmatprep.subr.bf16.mxu0 %v911_v34 }
  0x3e   :  { %828 = vmatpush3.bf16.msra.mxu1 %v907_v30  ;;  %v747_v30 = vld [vmem:[%s1220_s6] ss:$0 sm:$0xff] }
  0x3f   :  { %829 = vmatprep.subr.bf16.mxu1 %v963_v0  ;;  %770 = vmatpush3.bf16.msra.mxu0 %v912_v35  ;;  %v748_v35 = vld [vmem:[%s1222_s8] ss:$0 sm:$0xff] }
  0x40   :  { %839 = vmatprep.subr.mxu0 %v963_v0 }
  0x42   :  { %830 = vmatpush3.bf16.msra.mxu1 %v910_v33 }
  0x43   :  { %831 = vmatprep.subr.bf16.mxu1 %v963_v0 }
  0x46   :  { %832 = vmatpush3.bf16.msra.mxu1 %v913_v36 }
  0x47   :  { %833 = vmatprep.subr.bf16.mxu1 %v963_v0 }
  0x4a   :  { %834 = vmatpush3.bf16.msra.mxu1 %v914_v37 }
  0x4b   :  { %874 = vmatprep.subr.mxu1 %v963_v0 }
  0xe5   :  { %v169_v45 = vpop.f32.mrf.mxu1 }
  0xe6   :  { %v170_v46 = vadd.f32 %v169_v45, %v77_v43 }
  0xe7   :  { %v171_v48 = vpop.f32.mrf.mxu1 }
  0xe8   :  { %v172_v49 = vadd.f32 %v171_v48, %v81_v44  ;;  %v244_v50 = vmax.f32 %v170_v46, 0.0 }
  0xea   :  { %v245_v52 = vmax.f32 %v172_v49, 0.0  ;;  %v247_v54 = vpack.c.bf16 %v244_v50, %v244_v50 }
  0xec   :  { %v248_v53 = vpack.c.bf16 %v245_v52, %v245_v52 }
  0xed   :  { %v240_v55 = vpop.f32.mrf.mxu1 }
  0xee   :  { %v241_v57 = vadd.f32 %v240_v55, %v85_v51  ;;  %481 = vmatprep.mubr.bf16.mxu0 %v248_v53 }
  0xef   :  { %v818_v58 = vpop.f32.mrf.mxu1  ;;  %482 = vmatmul.mubr.bf16.vlgmr.msra.gmra.mxu0 %v247_v54 }
  0xf0   :  { %v246_v60 = vmax.f32 %v241_v57, 0.0  ;;  %840 = vmatpush3.msra.mxu0 %v545_v56  ;;  %871 = vmatprep.mubr.msk.f32.mxu0 %vm964_vm2, %v963_v0 }
  0xf1   :  { %841 = vmatprep.subr.mxu0 %v963_v0 }
  0xf2   :  { %v249_v62 = vpack.c.bf16 %v246_v60, %v246_v60  ;;  %842 = vmatpush3.msra.mxu0 %v544_v59 }
  0xf3   :  { %843 = vmatprep.subr.mxu0 %v963_v0 }
  0xf4   :  { %836 = vmatmul.mubr.bf16.vlgmr.msra.gmra.mxu1 %v249_v62  ;;  %844 = vmatpush3.msra.mxu0 %v543_v61 }
  0xf5   :  { %845 = vmatprep.subr.mxu0 %v963_v0  ;;  %882 = vmatprep.mubr.msk.f32.mxu1 %vm964_vm2, %v963_v0 }
  0xf6   :  { %846 = vmatpush3.msra.mxu0 %v542_v63  ;;  %875 = vmatpush3.msra.mxu1 %v627_v13 }
  0xf7   :  { %847 = vmatprep.subr.mxu0 %v963_v0  ;;  %876 = vmatprep.subr.mxu1 %v963_v0 }
  0xf8   :  { %848 = vmatpush3.msra.mxu0 %v541_v1  ;;  %877 = vmatpush3.msra.mxu1 %v626_v14 }
  0xf9   :  { %849 = vmatprep.subr.mxu0 %v963_v0  ;;  %878 = vmatprep.subr.mxu1 %v963_v0 }
  0xfa   :  { %850 = vmatpush3.msra.mxu0 %v540_v2  ;;  %879 = vmatpush3.msra.mxu1 %v625_v28 }
  0xfb   :  { %851 = vmatprep.subr.mxu0 %v963_v0  ;;  %880 = vmatprep.subr.mxu1 %v963_v0 }
  0xfc   :  { %852 = vmatpush3.msra.mxu0 %v539_v3  ;;  %881 = vmatpush3.msra.mxu1 %v624_v29 }
  0xfd   :  { %853 = vmatprep.subr.mxu0 %v963_v0 }
  0xfe   :  { %854 = vmatpush3.msra.mxu0 %v538_v4 }
  0xff   :  { %855 = vmatprep.subr.mxu0 %v963_v0 }
 0x100   :  { %856 = vmatpush3.msra.mxu0 %v537_v5 }
 0x101   :  { %857 = vmatprep.subr.mxu0 %v963_v0 }
 0x102   :  { %858 = vmatpush3.msra.mxu0 %v536_v6 }
 0x103   :  { %859 = vmatprep.subr.mxu0 %v963_v0 }
 0x104   :  { %860 = vmatpush3.msra.mxu0 %v535_v7 }
 0x105   :  { %861 = vmatprep.subr.mxu0 %v963_v0 }
 0x106   :  { %862 = vmatpush3.msra.mxu0 %v534_v8 }
 0x107   :  { %863 = vmatprep.subr.mxu0 %v963_v0 }
 0x108   :  { %864 = vmatpush3.msra.mxu0 %v533_v9 }
 0x109   :  { %865 = vmatprep.subr.mxu0 %v963_v0 }
 0x10a   :  { %866 = vmatpush3.msra.mxu0 %v532_v10 }
 0x10b   :  { %867 = vmatprep.subr.mxu0 %v963_v0 }
 0x10c   :  { %868 = vmatpush3.msra.mxu0 %v531_v11 }
 0x10d   :  { %869 = vmatprep.subr.mxu0 %v963_v0 }
 0x10e   :  { %870 = vmatpush3.msra.mxu0 %v530_v12 }
 0x1af   :  { %v771_v15 = vpop.f32.mrf.mxu0 }
 0x1b1   :  { %v772_v16 = vpop.f32.mrf.mxu0 }
 0x1b2   :  { %v773_v18 = vadd.f32 %v772_v16, %v771_v15 }
 0x1b3   :  { %v774_v19 = vpop.f32.mrf.mxu0 }
 0x1b4   :  { %v484_v20 = vadd.f32 %v773_v18, %v722_v17  ;;  %v523_v21 = vpop.f32.mrf.mxu1 }
 0x1b5   :  { %v775_v22 = vpop.f32.mrf.mxu0 }
 0x1b6   :  { %v524_v23 = vadd.f32 %v523_v21, %v484_v20  ;;  %v837_v24 = vpop.f32.mrf.mxu1 }
 0x1b8   :  { %v529_v25 = vmax.f32 %v524_v23, 0.0  ;;  %v526_v26 = vpop.f32.mrf.mxu1 }
 0x1ba   :  { %v838_v27 = vpop.f32.mrf.mxu1  ;;  %872 = vmatmul.mubr.f32.vlgmr.msra.gmra.mxu0 %v529_v25 }
 0x27a   :  { %v619_v31 = vpop.f32.mrf.mxu0 }
 0x27b   :  { %v620_v32 = vadd.f32 %v747_v30, %v619_v31 }
 0x27c   :  { %v873_v33 = vpop.f32.mrf.mxu0 }
 0x27d   :  { %v623_v34 = vmax.f32 %v620_v32, 0.0 }
 0x27f   :  { %883 = vmatmul.mubr.msk.f32.vlgmr.msra.gmra.mxu1 %vm635_vm3, %v623_v34 }
 0x33f   :  { %v705_v0 = vpop.f32.mrf.mxu1 }
 0x340   :  { %v706_v36 = vadd.f32 %v748_v35, %v705_v0 }
 0x341   :  { %v884_v37 = vpop.f32.mrf.mxu1 }
 0x342   :  { %710 = vst.msk [vmem:[%s1223_s9] sm:$0xff] %vm709_vm4, %v706_v36 }
 0x343   :  { %715 = vsyncpa [#allocation3], 1 }
 0x344   :  { %716 = vsyncpa [#allocation5], 1 }

</bundles_post_ra>
